<compile_context>
chip_gen: v7x
topology: tpu7x:2x2x1
jax: 0.10.0
libtpu: 0.0.40
codegen_flags: <defaults>
</compile_context>

<pallas_src>
import functools

import numpy as np
import jax
import jax.numpy as jnp
from jax import lax
from jax.experimental import pallas as pl
from jax.experimental.pallas import tpu as pltpu


# -----------------------------------------------------------------------------
# Shift8 Pallas kernel
# -----------------------------------------------------------------------------

def _dirs(s):
    # (dy, dx) per group k:  out[:, kg:(k+1)g, y, x] = x[:, ..., y+dy, x+dx]  (0 outside)
    # Matches the PyTorch slicing (start offsets r0 = s+dy, c0 = s+dx into pad_x).
    return ((-s, 0), (s, 0), (0, -s), (0, s),
            (s, s), (s, -s), (-s, s), (-s, -s))


def _shift8_kernel(x_ref, col_ref, o_ref, *, bt, g, h, w, stride):
    """x_ref/o_ref: (bt, 8, g, h*w) blocks; col_ref: (1, h*w) with col[p] = p % w."""
    L = h * w
    col = col_ref[...]                                 # (1, L) int32 column index
    p = lax.broadcasted_iota(jnp.int32, (1, L), 1)     # (1, L) flat index y*w + x

    # Fully static unroll over the 8 shift directions; masks hoisted per direction.
    for k, (dy, dx) in enumerate(_dirs(stride)):
        # out[p] = x_flat[p + D], D = dy*w + dx; roll(x, s)[i] = x[i - s] => s = -D mod L.
        D = dy * w + dx
        sh = (-D) % L

        conds = []
        if dy > 0:
            conds.append(p < (h - dy) * w)             # y < h - dy
        elif dy < 0:
            conds.append(p >= (-dy) * w)               # y >= -dy
        if dx > 0:
            conds.append(col < (w - dx))               # x < w - dx
        elif dx < 0:
            conds.append(col >= (-dx))                 # x >= -dx
        mask = None
        if conds:
            mask = conds[0]
            for c in conds[1:]:
                mask = mask & c

        for ib in range(bt):                           # static unroll over batch tile
            rolled = pltpu.roll(x_ref[ib, k], sh, 1)   # (g, L), XLU lane rotation
            if mask is not None:
                rolled = jnp.where(mask, rolled, jnp.zeros_like(rolled))
            o_ref[ib, k] = rolled


@functools.partial(jax.jit, static_argnames=("groups", "stride", "mode"))
def shift8(x, groups=4, stride=1, mode="constant"):
    """Pallas Shift8: NCHW input with c == 8 * groups, zero ('constant') padding."""
    b, c, h, w = x.shape
    assert c == groups * 8, "channels must equal 8 * groups"
    assert 0 < stride < min(h, w)
    if mode != "constant":
        # TODO(synk): only 'constant' (zero) padding mode is implemented.
        raise NotImplementedError("only mode='constant' supported")

    g = groups
    L = h * w
    # Metadata-only reshape: channel index k*g + j -> (k, j); (h, w) -> flat lane axis.
    xr = x.reshape(b, 8, g, L)
    # Precomputed column index (p % w) — avoids vector integer div/mod in-kernel.
    col = jnp.asarray(np.tile(np.arange(w, dtype=np.int32), h)[None, :])

    # Fold several batch elements into one block (<= ~2 MiB) to amortize the per-grid-step
    # overhead; choose bt dividing b so every block is full.
    bytes_per_batch = c * L * x.dtype.itemsize
    budget = 2 << 20
    bt = max(1, min(b, budget // max(1, bytes_per_batch)))
    while b % bt:
        bt -= 1

    kernel = functools.partial(_shift8_kernel, bt=bt, g=g, h=h, w=w, stride=stride)
    out = pl.pallas_call(
        kernel,
        out_shape=jax.ShapeDtypeStruct((b, 8, g, L), x.dtype),
        grid=(b // bt,),
        in_specs=[
            pl.BlockSpec((bt, 8, g, L), lambda i: (i, 0, 0, 0)),
            pl.BlockSpec((1, L), lambda i: (0, 0)),
        ],
        out_specs=pl.BlockSpec((bt, 8, g, L), lambda i: (i, 0, 0, 0)),
        compiler_params=pltpu.CompilerParams(
            dimension_semantics=("parallel",)),
        cost_estimate=pl.CostEstimate(
            flops=0, transcendentals=0,
            bytes_accessed=2 * b * c * h * w * x.dtype.itemsize),
    )(xr, col)
    # TODO(synk): for very large feature maps (c*h*w*itemsize per batch approaching the
    # scoped-VMEM default / v7x's 64 MiB), add an H-tile grid axis with a +-stride halo.
    return out.reshape(b, c, h, w)


def _shift8_reference(x, groups=4, stride=1):
    """Pure-JAX reference mirroring the PyTorch Shift8.forward, for verification."""
    b, c, h, w = x.shape
    s, g = stride, groups
    xp = jnp.pad(x, ((0, 0), (0, 0), (s, s), (s, s)))
    starts = [(0, s), (2 * s, s), (s, 0), (s, 2 * s),
              (2 * s, 2 * s), (2 * s, 0), (0, 2 * s), (0, 0)]
    chunks = [xp[:, k * g:(k + 1) * g, r0:r0 + h, c0:c0 + w]
              for k, (r0, c0) in enumerate(starts)]
    return jnp.concatenate(chunks, axis=1)


# -----------------------------------------------------------------------------
# UpShiftPixelShuffle forward:
#   Conv2d(1x1) -> LeakyReLU(0.02) -> Shift8 -> Conv2d(1x1, dim*scale^2) -> PixelShuffle
# Convs / activation / pixel-shuffle are plain JAX; Shift8 uses the Pallas kernel.
# -----------------------------------------------------------------------------

def _pixel_shuffle(x, r):
    b, crr, h, w = x.shape
    c = crr // (r * r)
    x = x.reshape(b, c, r, r, h, w)
    x = jnp.transpose(x, (0, 1, 4, 2, 5, 3))
    return x.reshape(b, c, h * r, w * r)


def _conv1x1(x, w, b):
    return jnp.einsum("oi,bihw->bohw", w, x) + b[None, :, None, None]


def up_shift_pixel_shuffle(x, w1, b1, w2, b2, *, scale=2, stride=1, shift_impl=None):
    dim = x.shape[1]
    groups = dim // 8
    shift = shift_impl if shift_impl is not None else (
        lambda t: shift8(t, groups=groups, stride=stride))
    y = _conv1x1(x, w1, b1)
    y = jnp.where(y >= 0, y, 0.02 * y)          # LeakyReLU(0.02)
    y = shift(y)
    y = _conv1x1(y, w2, b2)
    return _pixel_shuffle(y, scale)


if __name__ == "__main__":
    dim, scale, stride = 32, 2, 1               # groups = dim // 8 = 4
    groups = dim // 8
    b, h, w = 2, 16, 16

    key = jax.random.PRNGKey(0)
    kx, k1, k2, k3, k4 = jax.random.split(key, 5)
    x = jax.random.normal(kx, (b, dim, h, w), dtype=jnp.float32)

    # --- Shift8 Pallas kernel vs pure-JAX reference (bit-exact) ---
    out = jax.block_until_ready(shift8(x, groups=groups, stride=stride))
    ref = _shift8_reference(x, groups=groups, stride=stride)
    assert out.shape == (b, dim, h, w)
    assert jnp.array_equal(out, ref), "Shift8 mismatch vs reference"

    # --- Full UpShiftPixelShuffle forward ---
    w1 = 0.1 * jax.random.normal(k1, (dim, dim), jnp.float32)
    b1 = 0.1 * jax.random.normal(k2, (dim,), jnp.float32)
    w2 = 0.1 * jax.random.normal(k3, (dim * scale * scale, dim), jnp.float32)
    b2 = 0.1 * jax.random.normal(k4, (dim * scale * scale,), jnp.float32)

    y = up_shift_pixel_shuffle(x, w1, b1, w2, b2, scale=scale, stride=stride)
    y = jax.block_until_ready(y)
    y_ref = up_shift_pixel_shuffle(
        x, w1, b1, w2, b2, scale=scale, stride=stride,
        shift_impl=lambda t: _shift8_reference(t, groups=groups, stride=stride))
    assert y.shape == (b, dim, h * scale, w * scale)
    assert jnp.allclose(y, y_ref, atol=1e-5, rtol=1e-5), \
        "UpShiftPixelShuffle mismatch vs reference"

    print("KERNEL_OK")
</pallas_src>

<mosaic_0001>
module attributes {stable_mosaic.version = 11 : i64} {
  func.func @_shift8_kernel(%arg0: i32, %arg1: memref<2x8x4x256xf32, #tpu.memory_space<vmem>>, %arg2: memref<1x256xi32, #tpu.memory_space<vmem>>, %arg3: memref<2x8x4x256xf32, #tpu.memory_space<vmem>>) attributes {dimension_semantics = [#tpu.dimension_semantics<parallel>], iteration_bounds = array<i64: 1>, scalar_prefetch = 0 : i64, scratch_operands = 0 : i64, tpu.core_type = #tpu.core_type<tc>, window_params = [{transform_indices = @transform_0, window_bounds = array<i64: 2, 8, 4, 256>}, {pipeline_mode = #tpu.pipeline_mode<synchronous>, transform_indices = @transform_1, window_bounds = array<i64: 1, 256>}, {transform_indices = @transform_2, window_bounds = array<i64: 2, 8, 4, 256>}]} {
    %c0 = arith.constant 0 : index
    %c0_0 = arith.constant 0 : index
    %0 = vector.load %arg2[%c0, %c0_0] : memref<1x256xi32, #tpu.memory_space<vmem>>, vector<1x256xi32>
    %1 = tpu.iota {dimensions = array<i32: 1>} : vector<1x256xi32>
    %c16_i32 = arith.constant 16 : i32
    %2 = vector.broadcast %c16_i32 : i32 to vector<1x256xi32>
    %3 = arith.cmpi sge, %1, %2 : vector<1x256xi32>
    %c0_1 = arith.constant 0 : index
    %c0_2 = arith.constant 0 : index
    %c0_3 = arith.constant 0 : index
    %c0_4 = arith.constant 0 : index
    %4 = vector.load %arg1[%c0_1, %c0_2, %c0_3, %c0_4] : memref<2x8x4x256xf32, #tpu.memory_space<vmem>>, vector<1x1x4x256xf32>
    %5 = vector.shape_cast %4 : vector<1x1x4x256xf32> to vector<4x256xf32>
    %c16_i32_5 = arith.constant 16 : i32
    %6 = tpu.dynamic_rotate %5 by %c16_i32_5 dim 1 : vector<4x256xf32>, i32 -> vector<4x256xf32>
    %cst = arith.constant 0.000000e+00 : f32
    %7 = vector.broadcast %cst : f32 to vector<4x256xf32>
    %8 = vector.shape_cast %3 : vector<1x256xi1> to vector<1x256xi1>
    %9 = vector.broadcast %8 : vector<1x256xi1> to vector<4x256xi1>
    %10 = arith.select %9, %6, %7 : vector<4x256xi1>, vector<4x256xf32>
    %c0_6 = arith.constant 0 : index
    %c0_7 = arith.constant 0 : index
    %c0_8 = arith.constant 0 : index
    %c0_9 = arith.constant 0 : index
    %11 = vector.load %arg3[%c0_6, %c0_7, %c0_8, %c0_9] : memref<2x8x4x256xf32, #tpu.memory_space<vmem>>, vector<1x1x4x256xf32>
    %12 = vector.shape_cast %11 : vector<1x1x4x256xf32> to vector<4x256xf32>
    %13 = vector.shape_cast %10 : vector<4x256xf32> to vector<1x1x4x256xf32>
    tpu.vector_store %arg3[%c0_6, %c0_7, %c0_8, %c0_9], %13 {strides = array<i32>} : memref<2x8x4x256xf32, #tpu.memory_space<vmem>>, vector<1x1x4x256xf32>,
    %c1 = arith.constant 1 : index
    %c0_10 = arith.constant 0 : index
    %c0_11 = arith.constant 0 : index
    %c0_12 = arith.constant 0 : index
    %14 = vector.load %arg1[%c1, %c0_10, %c0_11, %c0_12] : memref<2x8x4x256xf32, #tpu.memory_space<vmem>>, vector<1x1x4x256xf32>
    %15 = vector.shape_cast %14 : vector<1x1x4x256xf32> to vector<4x256xf32>
    %c16_i32_13 = arith.constant 16 : i32
    %16 = tpu.dynamic_rotate %15 by %c16_i32_13 dim 1 : vector<4x256xf32>, i32 -> vector<4x256xf32>
    %cst_14 = arith.constant 0.000000e+00 : f32
    %17 = vector.broadcast %cst_14 : f32 to vector<4x256xf32>
    %18 = vector.shape_cast %3 : vector<1x256xi1> to vector<1x256xi1>
    %19 = vector.broadcast %18 : vector<1x256xi1> to vector<4x256xi1>
    %20 = arith.select %19, %16, %17 : vector<4x256xi1>, vector<4x256xf32>
    %c1_15 = arith.constant 1 : index
    %c0_16 = arith.constant 0 : index
    %c0_17 = arith.constant 0 : index
    %c0_18 = arith.constant 0 : index
    %21 = vector.load %arg3[%c1_15, %c0_16, %c0_17, %c0_18] : memref<2x8x4x256xf32, #tpu.memory_space<vmem>>, vector<1x1x4x256xf32>
    %22 = vector.shape_cast %21 : vector<1x1x4x256xf32> to vector<4x256xf32>
    %23 = vector.shape_cast %20 : vector<4x256xf32> to vector<1x1x4x256xf32>
    tpu.vector_store %arg3[%c1_15, %c0_16, %c0_17, %c0_18], %23 {strides = array<i32>} : memref<2x8x4x256xf32, #tpu.memory_space<vmem>>, vector<1x1x4x256xf32>,
    %c240_i32 = arith.constant 240 : i32
    %24 = vector.broadcast %c240_i32 : i32 to vector<1x256xi32>
    %25 = arith.cmpi slt, %1, %24 : vector<1x256xi32>
    %c0_19 = arith.constant 0 : index
    %c1_20 = arith.constant 1 : index
    %c0_21 = arith.constant 0 : index
    %c0_22 = arith.constant 0 : index
    %26 = vector.load %arg1[%c0_19, %c1_20, %c0_21, %c0_22] : memref<2x8x4x256xf32, #tpu.memory_space<vmem>>, vector<1x1x4x256xf32>
    %27 = vector.shape_cast %26 : vector<1x1x4x256xf32> to vector<4x256xf32>
    %c240_i32_23 = arith.constant 240 : i32
    %28 = tpu.dynamic_rotate %27 by %c240_i32_23 dim 1 : vector<4x256xf32>, i32 -> vector<4x256xf32>
    %cst_24 = arith.constant 0.000000e+00 : f32
    %29 = vector.broadcast %cst_24 : f32 to vector<4x256xf32>
    %30 = vector.shape_cast %25 : vector<1x256xi1> to vector<1x256xi1>
    %31 = vector.broadcast %30 : vector<1x256xi1> to vector<4x256xi1>
    %32 = arith.select %31, %28, %29 : vector<4x256xi1>, vector<4x256xf32>
    %c0_25 = arith.constant 0 : index
    %c1_26 = arith.constant 1 : index
    %c0_27 = arith.constant 0 : index
    %c0_28 = arith.constant 0 : index
    %33 = vector.load %arg3[%c0_25, %c1_26, %c0_27, %c0_28] : memref<2x8x4x256xf32, #tpu.memory_space<vmem>>, vector<1x1x4x256xf32>
    %34 = vector.shape_cast %33 : vector<1x1x4x256xf32> to vector<4x256xf32>
    %35 = vector.shape_cast %32 : vector<4x256xf32> to vector<1x1x4x256xf32>
    tpu.vector_store %arg3[%c0_25, %c1_26, %c0_27, %c0_28], %35 {strides = array<i32>} : memref<2x8x4x256xf32, #tpu.memory_space<vmem>>, vector<1x1x4x256xf32>,
    %c1_29 = arith.constant 1 : index
    %c1_30 = arith.constant 1 : index
    %c0_31 = arith.constant 0 : index
    %c0_32 = arith.constant 0 : index
    %36 = vector.load %arg1[%c1_29, %c1_30, %c0_31, %c0_32] : memref<2x8x4x256xf32, #tpu.memory_space<vmem>>, vector<1x1x4x256xf32>
    %37 = vector.shape_cast %36 : vector<1x1x4x256xf32> to vector<4x256xf32>
    %c240_i32_33 = arith.constant 240 : i32
    %38 = tpu.dynamic_rotate %37 by %c240_i32_33 dim 1 : vector<4x256xf32>, i32 -> vector<4x256xf32>
    %cst_34 = arith.constant 0.000000e+00 : f32
    %39 = vector.broadcast %cst_34 : f32 to vector<4x256xf32>
    %40 = vector.shape_cast %25 : vector<1x256xi1> to vector<1x256xi1>
    %41 = vector.broadcast %40 : vector<1x256xi1> to vector<4x256xi1>
    %42 = arith.select %41, %38, %39 : vector<4x256xi1>, vector<4x256xf32>
    %c1_35 = arith.constant 1 : index
    %c1_36 = arith.constant 1 : index
    %c0_37 = arith.constant 0 : index
    %c0_38 = arith.constant 0 : index
    %43 = vector.load %arg3[%c1_35, %c1_36, %c0_37, %c0_38] : memref<2x8x4x256xf32, #tpu.memory_space<vmem>>, vector<1x1x4x256xf32>
    %44 = vector.shape_cast %43 : vector<1x1x4x256xf32> to vector<4x256xf32>
    %45 = vector.shape_cast %42 : vector<4x256xf32> to vector<1x1x4x256xf32>
    tpu.vector_store %arg3[%c1_35, %c1_36, %c0_37, %c0_38], %45 {strides = array<i32>} : memref<2x8x4x256xf32, #tpu.memory_space<vmem>>, vector<1x1x4x256xf32>,
    %c1_i32 = arith.constant 1 : i32
    %46 = vector.broadcast %c1_i32 : i32 to vector<1x256xi32>
    %47 = arith.cmpi sge, %0, %46 : vector<1x256xi32>
    %c0_39 = arith.constant 0 : index
    %c2 = arith.constant 2 : index
    %c0_40 = arith.constant 0 : index
    %c0_41 = arith.constant 0 : index
    %48 = vector.load %arg1[%c0_39, %c2, %c0_40, %c0_41] : memref<2x8x4x256xf32, #tpu.memory_space<vmem>>, vector<1x1x4x256xf32>
    %49 = vector.shape_cast %48 : vector<1x1x4x256xf32> to vector<4x256xf32>
    %c1_i32_42 = arith.constant 1 : i32
    %50 = tpu.dynamic_rotate %49 by %c1_i32_42 dim 1 : vector<4x256xf32>, i32 -> vector<4x256xf32>
    %cst_43 = arith.constant 0.000000e+00 : f32
    %51 = vector.broadcast %cst_43 : f32 to vector<4x256xf32>
    %52 = vector.shape_cast %47 : vector<1x256xi1> to vector<1x256xi1>
    %53 = vector.broadcast %52 : vector<1x256xi1> to vector<4x256xi1>
    %54 = arith.select %53, %50, %51 : vector<4x256xi1>, vector<4x256xf32>
    %c0_44 = arith.constant 0 : index
    %c2_45 = arith.constant 2 : index
    %c0_46 = arith.constant 0 : index
    %c0_47 = arith.constant 0 : index
    %55 = vector.load %arg3[%c0_44, %c2_45, %c0_46, %c0_47] : memref<2x8x4x256xf32, #tpu.memory_space<vmem>>, vector<1x1x4x256xf32>
    %56 = vector.shape_cast %55 : vector<1x1x4x256xf32> to vector<4x256xf32>
    %57 = vector.shape_cast %54 : vector<4x256xf32> to vector<1x1x4x256xf32>
    tpu.vector_store %arg3[%c0_44, %c2_45, %c0_46, %c0_47], %57 {strides = array<i32>} : memref<2x8x4x256xf32, #tpu.memory_space<vmem>>, vector<1x1x4x256xf32>,
    %c1_48 = arith.constant 1 : index
    %c2_49 = arith.constant 2 : index
    %c0_50 = arith.constant 0 : index
    %c0_51 = arith.constant 0 : index
    %58 = vector.load %arg1[%c1_48, %c2_49, %c0_50, %c0_51] : memref<2x8x4x256xf32, #tpu.memory_space<vmem>>, vector<1x1x4x256xf32>
    %59 = vector.shape_cast %58 : vector<1x1x4x256xf32> to vector<4x256xf32>
    %c1_i32_52 = arith.constant 1 : i32
    %60 = tpu.dynamic_rotate %59 by %c1_i32_52 dim 1 : vector<4x256xf32>, i32 -> vector<4x256xf32>
    %cst_53 = arith.constant 0.000000e+00 : f32
    %61 = vector.broadcast %cst_53 : f32 to vector<4x256xf32>
    %62 = vector.shape_cast %47 : vector<1x256xi1> to vector<1x256xi1>
    %63 = vector.broadcast %62 : vector<1x256xi1> to vector<4x256xi1>
    %64 = arith.select %63, %60, %61 : vector<4x256xi1>, vector<4x256xf32>
    %c1_54 = arith.constant 1 : index
    %c2_55 = arith.constant 2 : index
    %c0_56 = arith.constant 0 : index
    %c0_57 = arith.constant 0 : index
    %65 = vector.load %arg3[%c1_54, %c2_55, %c0_56, %c0_57] : memref<2x8x4x256xf32, #tpu.memory_space<vmem>>, vector<1x1x4x256xf32>
    %66 = vector.shape_cast %65 : vector<1x1x4x256xf32> to vector<4x256xf32>
    %67 = vector.shape_cast %64 : vector<4x256xf32> to vector<1x1x4x256xf32>
    tpu.vector_store %arg3[%c1_54, %c2_55, %c0_56, %c0_57], %67 {strides = array<i32>} : memref<2x8x4x256xf32, #tpu.memory_space<vmem>>, vector<1x1x4x256xf32>,
    %c15_i32 = arith.constant 15 : i32
    %68 = vector.broadcast %c15_i32 : i32 to vector<1x256xi32>
    %69 = arith.cmpi slt, %0, %68 : vector<1x256xi32>
    %c0_58 = arith.constant 0 : index
    %c3 = arith.constant 3 : index
    %c0_59 = arith.constant 0 : index
    %c0_60 = arith.constant 0 : index
    %70 = vector.load %arg1[%c0_58, %c3, %c0_59, %c0_60] : memref<2x8x4x256xf32, #tpu.memory_space<vmem>>, vector<1x1x4x256xf32>
    %71 = vector.shape_cast %70 : vector<1x1x4x256xf32> to vector<4x256xf32>
    %c255_i32 = arith.constant 255 : i32
    %72 = tpu.dynamic_rotate %71 by %c255_i32 dim 1 : vector<4x256xf32>, i32 -> vector<4x256xf32>
    %cst_61 = arith.constant 0.000000e+00 : f32
    %73 = vector.broadcast %cst_61 : f32 to vector<4x256xf32>
    %74 = vector.shape_cast %69 : vector<1x256xi1> to vector<1x256xi1>
    %75 = vector.broadcast %74 : vector<1x256xi1> to vector<4x256xi1>
    %76 = arith.select %75, %72, %73 : vector<4x256xi1>, vector<4x256xf32>
    %c0_62 = arith.constant 0 : index
    %c3_63 = arith.constant 3 : index
    %c0_64 = arith.constant 0 : index
    %c0_65 = arith.constant 0 : index
    %77 = vector.load %arg3[%c0_62, %c3_63, %c0_64, %c0_65] : memref<2x8x4x256xf32, #tpu.memory_space<vmem>>, vector<1x1x4x256xf32>
    %78 = vector.shape_cast %77 : vector<1x1x4x256xf32> to vector<4x256xf32>
    %79 = vector.shape_cast %76 : vector<4x256xf32> to vector<1x1x4x256xf32>
    tpu.vector_store %arg3[%c0_62, %c3_63, %c0_64, %c0_65], %79 {strides = array<i32>} : memref<2x8x4x256xf32, #tpu.memory_space<vmem>>, vector<1x1x4x256xf32>,
    %c1_66 = arith.constant 1 : index
    %c3_67 = arith.constant 3 : index
    %c0_68 = arith.constant 0 : index
    %c0_69 = arith.constant 0 : index
    %80 = vector.load %arg1[%c1_66, %c3_67, %c0_68, %c0_69] : memref<2x8x4x256xf32, #tpu.memory_space<vmem>>, vector<1x1x4x256xf32>
    %81 = vector.shape_cast %80 : vector<1x1x4x256xf32> to vector<4x256xf32>
    %c255_i32_70 = arith.constant 255 : i32
    %82 = tpu.dynamic_rotate %81 by %c255_i32_70 dim 1 : vector<4x256xf32>, i32 -> vector<4x256xf32>
    %cst_71 = arith.constant 0.000000e+00 : f32
    %83 = vector.broadcast %cst_71 : f32 to vector<4x256xf32>
    %84 = vector.shape_cast %69 : vector<1x256xi1> to vector<1x256xi1>
    %85 = vector.broadcast %84 : vector<1x256xi1> to vector<4x256xi1>
    %86 = arith.select %85, %82, %83 : vector<4x256xi1>, vector<4x256xf32>
    %c1_72 = arith.constant 1 : index
    %c3_73 = arith.constant 3 : index
    %c0_74 = arith.constant 0 : index
    %c0_75 = arith.constant 0 : index
    %87 = vector.load %arg3[%c1_72, %c3_73, %c0_74, %c0_75] : memref<2x8x4x256xf32, #tpu.memory_space<vmem>>, vector<1x1x4x256xf32>
    %88 = vector.shape_cast %87 : vector<1x1x4x256xf32> to vector<4x256xf32>
    %89 = vector.shape_cast %86 : vector<4x256xf32> to vector<1x1x4x256xf32>
    tpu.vector_store %arg3[%c1_72, %c3_73, %c0_74, %c0_75], %89 {strides = array<i32>} : memref<2x8x4x256xf32, #tpu.memory_space<vmem>>, vector<1x1x4x256xf32>,
    %c240_i32_76 = arith.constant 240 : i32
    %90 = vector.broadcast %c240_i32_76 : i32 to vector<1x256xi32>
    %91 = arith.cmpi slt, %1, %90 : vector<1x256xi32>
    %c15_i32_77 = arith.constant 15 : i32
    %92 = vector.broadcast %c15_i32_77 : i32 to vector<1x256xi32>
    %93 = arith.cmpi slt, %0, %92 : vector<1x256xi32>
    %94 = arith.andi %91, %93 : vector<1x256xi1>
    %c0_78 = arith.constant 0 : index
    %c4 = arith.constant 4 : index
    %c0_79 = arith.constant 0 : index
    %c0_80 = arith.constant 0 : index
    %95 = vector.load %arg1[%c0_78, %c4, %c0_79, %c0_80] : memref<2x8x4x256xf32, #tpu.memory_space<vmem>>, vector<1x1x4x256xf32>
    %96 = vector.shape_cast %95 : vector<1x1x4x256xf32> to vector<4x256xf32>
    %c239_i32 = arith.constant 239 : i32
    %97 = tpu.dynamic_rotate %96 by %c239_i32 dim 1 : vector<4x256xf32>, i32 -> vector<4x256xf32>
    %cst_81 = arith.constant 0.000000e+00 : f32
    %98 = vector.broadcast %cst_81 : f32 to vector<4x256xf32>
    %99 = vector.shape_cast %94 : vector<1x256xi1> to vector<1x256xi1>
    %100 = vector.broadcast %99 : vector<1x256xi1> to vector<4x256xi1>
    %101 = arith.select %100, %97, %98 : vector<4x256xi1>, vector<4x256xf32>
    %c0_82 = arith.constant 0 : index
    %c4_83 = arith.constant 4 : index
    %c0_84 = arith.constant 0 : index
    %c0_85 = arith.constant 0 : index
    %102 = vector.load %arg3[%c0_82, %c4_83, %c0_84, %c0_85] : memref<2x8x4x256xf32, #tpu.memory_space<vmem>>, vector<1x1x4x256xf32>
    %103 = vector.shape_cast %102 : vector<1x1x4x256xf32> to vector<4x256xf32>
    %104 = vector.shape_cast %101 : vector<4x256xf32> to vector<1x1x4x256xf32>
    tpu.vector_store %arg3[%c0_82, %c4_83, %c0_84, %c0_85], %104 {strides = array<i32>} : memref<2x8x4x256xf32, #tpu.memory_space<vmem>>, vector<1x1x4x256xf32>,
    %c1_86 = arith.constant 1 : index
    %c4_87 = arith.constant 4 : index
    %c0_88 = arith.constant 0 : index
    %c0_89 = arith.constant 0 : index
    %105 = vector.load %arg1[%c1_86, %c4_87, %c0_88, %c0_89] : memref<2x8x4x256xf32, #tpu.memory_space<vmem>>, vector<1x1x4x256xf32>
    %106 = vector.shape_cast %105 : vector<1x1x4x256xf32> to vector<4x256xf32>
    %c239_i32_90 = arith.constant 239 : i32
    %107 = tpu.dynamic_rotate %106 by %c239_i32_90 dim 1 : vector<4x256xf32>, i32 -> vector<4x256xf32>
    %cst_91 = arith.constant 0.000000e+00 : f32
    %108 = vector.broadcast %cst_91 : f32 to vector<4x256xf32>
    %109 = vector.shape_cast %94 : vector<1x256xi1> to vector<1x256xi1>
    %110 = vector.broadcast %109 : vector<1x256xi1> to vector<4x256xi1>
    %111 = arith.select %110, %107, %108 : vector<4x256xi1>, vector<4x256xf32>
    %c1_92 = arith.constant 1 : index
    %c4_93 = arith.constant 4 : index
    %c0_94 = arith.constant 0 : index
    %c0_95 = arith.constant 0 : index
    %112 = vector.load %arg3[%c1_92, %c4_93, %c0_94, %c0_95] : memref<2x8x4x256xf32, #tpu.memory_space<vmem>>, vector<1x1x4x256xf32>
    %113 = vector.shape_cast %112 : vector<1x1x4x256xf32> to vector<4x256xf32>
    %114 = vector.shape_cast %111 : vector<4x256xf32> to vector<1x1x4x256xf32>
    tpu.vector_store %arg3[%c1_92, %c4_93, %c0_94, %c0_95], %114 {strides = array<i32>} : memref<2x8x4x256xf32, #tpu.memory_space<vmem>>, vector<1x1x4x256xf32>,
    %c240_i32_96 = arith.constant 240 : i32
    %115 = vector.broadcast %c240_i32_96 : i32 to vector<1x256xi32>
    %116 = arith.cmpi slt, %1, %115 : vector<1x256xi32>
    %c1_i32_97 = arith.constant 1 : i32
    %117 = vector.broadcast %c1_i32_97 : i32 to vector<1x256xi32>
    %118 = arith.cmpi sge, %0, %117 : vector<1x256xi32>
    %119 = arith.andi %116, %118 : vector<1x256xi1>
    %c0_98 = arith.constant 0 : index
    %c5 = arith.constant 5 : index
    %c0_99 = arith.constant 0 : index
    %c0_100 = arith.constant 0 : index
    %120 = vector.load %arg1[%c0_98, %c5, %c0_99, %c0_100] : memref<2x8x4x256xf32, #tpu.memory_space<vmem>>, vector<1x1x4x256xf32>
    %121 = vector.shape_cast %120 : vector<1x1x4x256xf32> to vector<4x256xf32>
    %c241_i32 = arith.constant 241 : i32
    %122 = tpu.dynamic_rotate %121 by %c241_i32 dim 1 : vector<4x256xf32>, i32 -> vector<4x256xf32>
    %cst_101 = arith.constant 0.000000e+00 : f32
    %123 = vector.broadcast %cst_101 : f32 to vector<4x256xf32>
    %124 = vector.shape_cast %119 : vector<1x256xi1> to vector<1x256xi1>
    %125 = vector.broadcast %124 : vector<1x256xi1> to vector<4x256xi1>
    %126 = arith.select %125, %122, %123 : vector<4x256xi1>, vector<4x256xf32>
    %c0_102 = arith.constant 0 : index
    %c5_103 = arith.constant 5 : index
    %c0_104 = arith.constant 0 : index
    %c0_105 = arith.constant 0 : index
    %127 = vector.load %arg3[%c0_102, %c5_103, %c0_104, %c0_105] : memref<2x8x4x256xf32, #tpu.memory_space<vmem>>, vector<1x1x4x256xf32>
    %128 = vector.shape_cast %127 : vector<1x1x4x256xf32> to vector<4x256xf32>
    %129 = vector.shape_cast %126 : vector<4x256xf32> to vector<1x1x4x256xf32>
    tpu.vector_store %arg3[%c0_102, %c5_103, %c0_104, %c0_105], %129 {strides = array<i32>} : memref<2x8x4x256xf32, #tpu.memory_space<vmem>>, vector<1x1x4x256xf32>,
    %c1_106 = arith.constant 1 : index
    %c5_107 = arith.constant 5 : index
    %c0_108 = arith.constant 0 : index
    %c0_109 = arith.constant 0 : index
    %130 = vector.load %arg1[%c1_106, %c5_107, %c0_108, %c0_109] : memref<2x8x4x256xf32, #tpu.memory_space<vmem>>, vector<1x1x4x256xf32>
    %131 = vector.shape_cast %130 : vector<1x1x4x256xf32> to vector<4x256xf32>
    %c241_i32_110 = arith.constant 241 : i32
    %132 = tpu.dynamic_rotate %131 by %c241_i32_110 dim 1 : vector<4x256xf32>, i32 -> vector<4x256xf32>
    %cst_111 = arith.constant 0.000000e+00 : f32
    %133 = vector.broadcast %cst_111 : f32 to vector<4x256xf32>
    %134 = vector.shape_cast %119 : vector<1x256xi1> to vector<1x256xi1>
    %135 = vector.broadcast %134 : vector<1x256xi1> to vector<4x256xi1>
    %136 = arith.select %135, %132, %133 : vector<4x256xi1>, vector<4x256xf32>
    %c1_112 = arith.constant 1 : index
    %c5_113 = arith.constant 5 : index
    %c0_114 = arith.constant 0 : index
    %c0_115 = arith.constant 0 : index
    %137 = vector.load %arg3[%c1_112, %c5_113, %c0_114, %c0_115] : memref<2x8x4x256xf32, #tpu.memory_space<vmem>>, vector<1x1x4x256xf32>
    %138 = vector.shape_cast %137 : vector<1x1x4x256xf32> to vector<4x256xf32>
    %139 = vector.shape_cast %136 : vector<4x256xf32> to vector<1x1x4x256xf32>
    tpu.vector_store %arg3[%c1_112, %c5_113, %c0_114, %c0_115], %139 {strides = array<i32>} : memref<2x8x4x256xf32, #tpu.memory_space<vmem>>, vector<1x1x4x256xf32>,
    %c16_i32_116 = arith.constant 16 : i32
    %140 = vector.broadcast %c16_i32_116 : i32 to vector<1x256xi32>
    %141 = arith.cmpi sge, %1, %140 : vector<1x256xi32>
    %c15_i32_117 = arith.constant 15 : i32
    %142 = vector.broadcast %c15_i32_117 : i32 to vector<1x256xi32>
    %143 = arith.cmpi slt, %0, %142 : vector<1x256xi32>
    %144 = arith.andi %141, %143 : vector<1x256xi1>
    %c0_118 = arith.constant 0 : index
    %c6 = arith.constant 6 : index
    %c0_119 = arith.constant 0 : index
    %c0_120 = arith.constant 0 : index
    %145 = vector.load %arg1[%c0_118, %c6, %c0_119, %c0_120] : memref<2x8x4x256xf32, #tpu.memory_space<vmem>>, vector<1x1x4x256xf32>
    %146 = vector.shape_cast %145 : vector<1x1x4x256xf32> to vector<4x256xf32>
    %c15_i32_121 = arith.constant 15 : i32
    %147 = tpu.dynamic_rotate %146 by %c15_i32_121 dim 1 : vector<4x256xf32>, i32 -> vector<4x256xf32>
    %cst_122 = arith.constant 0.000000e+00 : f32
    %148 = vector.broadcast %cst_122 : f32 to vector<4x256xf32>
    %149 = vector.shape_cast %144 : vector<1x256xi1> to vector<1x256xi1>
    %150 = vector.broadcast %149 : vector<1x256xi1> to vector<4x256xi1>
    %151 = arith.select %150, %147, %148 : vector<4x256xi1>, vector<4x256xf32>
    %c0_123 = arith.constant 0 : index
    %c6_124 = arith.constant 6 : index
    %c0_125 = arith.constant 0 : index
    %c0_126 = arith.constant 0 : index
    %152 = vector.load %arg3[%c0_123, %c6_124, %c0_125, %c0_126] : memref<2x8x4x256xf32, #tpu.memory_space<vmem>>, vector<1x1x4x256xf32>
    %153 = vector.shape_cast %152 : vector<1x1x4x256xf32> to vector<4x256xf32>
    %154 = vector.shape_cast %151 : vector<4x256xf32> to vector<1x1x4x256xf32>
    tpu.vector_store %arg3[%c0_123, %c6_124, %c0_125, %c0_126], %154 {strides = array<i32>} : memref<2x8x4x256xf32, #tpu.memory_space<vmem>>, vector<1x1x4x256xf32>,
    %c1_127 = arith.constant 1 : index
    %c6_128 = arith.constant 6 : index
    %c0_129 = arith.constant 0 : index
    %c0_130 = arith.constant 0 : index
    %155 = vector.load %arg1[%c1_127, %c6_128, %c0_129, %c0_130] : memref<2x8x4x256xf32, #tpu.memory_space<vmem>>, vector<1x1x4x256xf32>
    %156 = vector.shape_cast %155 : vector<1x1x4x256xf32> to vector<4x256xf32>
    %c15_i32_131 = arith.constant 15 : i32
    %157 = tpu.dynamic_rotate %156 by %c15_i32_131 dim 1 : vector<4x256xf32>, i32 -> vector<4x256xf32>
    %cst_132 = arith.constant 0.000000e+00 : f32
    %158 = vector.broadcast %cst_132 : f32 to vector<4x256xf32>
    %159 = vector.shape_cast %144 : vector<1x256xi1> to vector<1x256xi1>
    %160 = vector.broadcast %159 : vector<1x256xi1> to vector<4x256xi1>
    %161 = arith.select %160, %157, %158 : vector<4x256xi1>, vector<4x256xf32>
    %c1_133 = arith.constant 1 : index
    %c6_134 = arith.constant 6 : index
    %c0_135 = arith.constant 0 : index
    %c0_136 = arith.constant 0 : index
    %162 = vector.load %arg3[%c1_133, %c6_134, %c0_135, %c0_136] : memref<2x8x4x256xf32, #tpu.memory_space<vmem>>, vector<1x1x4x256xf32>
    %163 = vector.shape_cast %162 : vector<1x1x4x256xf32> to vector<4x256xf32>
    %164 = vector.shape_cast %161 : vector<4x256xf32> to vector<1x1x4x256xf32>
    tpu.vector_store %arg3[%c1_133, %c6_134, %c0_135, %c0_136], %164 {strides = array<i32>} : memref<2x8x4x256xf32, #tpu.memory_space<vmem>>, vector<1x1x4x256xf32>,
    %c16_i32_137 = arith.constant 16 : i32
    %165 = vector.broadcast %c16_i32_137 : i32 to vector<1x256xi32>
    %166 = arith.cmpi sge, %1, %165 : vector<1x256xi32>
    %c1_i32_138 = arith.constant 1 : i32
    %167 = vector.broadcast %c1_i32_138 : i32 to vector<1x256xi32>
    %168 = arith.cmpi sge, %0, %167 : vector<1x256xi32>
    %169 = arith.andi %166, %168 : vector<1x256xi1>
    %c0_139 = arith.constant 0 : index
    %c7 = arith.constant 7 : index
    %c0_140 = arith.constant 0 : index
    %c0_141 = arith.constant 0 : index
    %170 = vector.load %arg1[%c0_139, %c7, %c0_140, %c0_141] : memref<2x8x4x256xf32, #tpu.memory_space<vmem>>, vector<1x1x4x256xf32>
    %171 = vector.shape_cast %170 : vector<1x1x4x256xf32> to vector<4x256xf32>
    %c17_i32 = arith.constant 17 : i32
    %172 = tpu.dynamic_rotate %171 by %c17_i32 dim 1 : vector<4x256xf32>, i32 -> vector<4x256xf32>
    %cst_142 = arith.constant 0.000000e+00 : f32
    %173 = vector.broadcast %cst_142 : f32 to vector<4x256xf32>
    %174 = vector.shape_cast %169 : vector<1x256xi1> to vector<1x256xi1>
    %175 = vector.broadcast %174 : vector<1x256xi1> to vector<4x256xi1>
    %176 = arith.select %175, %172, %173 : vector<4x256xi1>, vector<4x256xf32>
    %c0_143 = arith.constant 0 : index
    %c7_144 = arith.constant 7 : index
    %c0_145 = arith.constant 0 : index
    %c0_146 = arith.constant 0 : index
    %177 = vector.load %arg3[%c0_143, %c7_144, %c0_145, %c0_146] : memref<2x8x4x256xf32, #tpu.memory_space<vmem>>, vector<1x1x4x256xf32>
    %178 = vector.shape_cast %177 : vector<1x1x4x256xf32> to vector<4x256xf32>
    %179 = vector.shape_cast %176 : vector<4x256xf32> to vector<1x1x4x256xf32>
    tpu.vector_store %arg3[%c0_143, %c7_144, %c0_145, %c0_146], %179 {strides = array<i32>} : memref<2x8x4x256xf32, #tpu.memory_space<vmem>>, vector<1x1x4x256xf32>,
    %c1_147 = arith.constant 1 : index
    %c7_148 = arith.constant 7 : index
    %c0_149 = arith.constant 0 : index
    %c0_150 = arith.constant 0 : index
    %180 = vector.load %arg1[%c1_147, %c7_148, %c0_149, %c0_150] : memref<2x8x4x256xf32, #tpu.memory_space<vmem>>, vector<1x1x4x256xf32>
    %181 = vector.shape_cast %180 : vector<1x1x4x256xf32> to vector<4x256xf32>
    %c17_i32_151 = arith.constant 17 : i32
    %182 = tpu.dynamic_rotate %181 by %c17_i32_151 dim 1 : vector<4x256xf32>, i32 -> vector<4x256xf32>
    %cst_152 = arith.constant 0.000000e+00 : f32
    %183 = vector.broadcast %cst_152 : f32 to vector<4x256xf32>
    %184 = vector.shape_cast %169 : vector<1x256xi1> to vector<1x256xi1>
    %185 = vector.broadcast %184 : vector<1x256xi1> to vector<4x256xi1>
    %186 = arith.select %185, %182, %183 : vector<4x256xi1>, vector<4x256xf32>
    %c1_153 = arith.constant 1 : index
    %c7_154 = arith.constant 7 : index
    %c0_155 = arith.constant 0 : index
    %c0_156 = arith.constant 0 : index
    %187 = vector.load %arg3[%c1_153, %c7_154, %c0_155, %c0_156] : memref<2x8x4x256xf32, #tpu.memory_space<vmem>>, vector<1x1x4x256xf32>
    %188 = vector.shape_cast %187 : vector<1x1x4x256xf32> to vector<4x256xf32>
    %189 = vector.shape_cast %186 : vector<4x256xf32> to vector<1x1x4x256xf32>
    tpu.vector_store %arg3[%c1_153, %c7_154, %c0_155, %c0_156], %189 {strides = array<i32>} : memref<2x8x4x256xf32, #tpu.memory_space<vmem>>, vector<1x1x4x256xf32>,
    return
  }
  func.func @transform_0(%arg0: i32) -> (i32, i32, i32, i32) {
    %c0_i32 = arith.constant 0 : i32
    %c0_i32_0 = arith.constant 0 : i32
    %c0_i32_1 = arith.constant 0 : i32
    %c0_i32_2 = arith.constant 0 : i32
    return %arg0, %c0_i32, %c0_i32_0, %c0_i32_1 : i32, i32, i32, i32
  }
  func.func @transform_1(%arg0: i32) -> (i32, i32) {
    %c0_i32 = arith.constant 0 : i32
    %c0_i32_0 = arith.constant 0 : i32
    %c0_i32_1 = arith.constant 0 : i32
    return %c0_i32, %c0_i32_0 : i32, i32
  }
  func.func @transform_2(%arg0: i32) -> (i32, i32, i32, i32) {
    %c0_i32 = arith.constant 0 : i32
    %c0_i32_0 = arith.constant 0 : i32
    %c0_i32_1 = arith.constant 0 : i32
    %c0_i32_2 = arith.constant 0 : i32
    return %arg0, %c0_i32, %c0_i32_0, %c0_i32_1 : i32, i32, i32, i32
  }
}

</mosaic_0001>

<bundles_post_ra>
// kernel: shift8.1
= control target key start
LH: loop header
LB: loop body
LE: loop exit
PB: predicated region body
PF: predicated region fallthrough
CT: control target
= control target key end

     0   :  { %s480_s13 = smov 16   ;;  %s481_s18 = smov 112   ;;  %v12_v32 = vlaneseq  ;;  %v488_v53 = vmov 0   ;;  %s817_s0 = inlined_call_operand.vmem [shape: f32[2,8,4,256], index: 0, kind: input, shape index: {}]   ;;  %s818_s1 = inlined_call_operand.vmem [shape: s32[1,256], index: 1, kind: input, shape index: {}]   ;;  %s819_s2 = inlined_call_operand.vmem [shape: f32[2,8,4,256], index: 2, kind: output, shape index: {}]  }
   0x1   :  { %v425_v0 = vld [vmem:[%s817_s0 + $0x40] sm:$0xff]  ;;  %v427_v4 = vld [vmem:[%s817_s0 + $0x8] sm:$0xff]  ;;  %v431_v8 = vld [vmem:[%s817_s0 + $0x10] sm:$0xff]  ;;  %s482_s23 = smov 1   ;;  %s483_s28 = smov 127  }
   0x2   :  { %v17_v1 = vld [vmem:[%s817_s0] sm:$0xff]  ;;  %44 = vrot.lane.b32.xlu1 %v425_v0, %s480_s13  ;;  %v42_v2 = vcombine.high %v425_v0, %v425_v0  ;;  %v63_v5 = vcombine.high %v427_v4, %v427_v4  ;;  %v429_v6 = vld [vmem:[%s817_s0 + $0x48] sm:$0xff]  ;;  %v107_v9 = vcombine.high %v431_v8, %v431_v8  ;;  %v433_v10 = vld [vmem:[%s817_s0 + $0x50] sm:$0xff]  ;;  %s484_s5 = smov 111   ;;  %s485_s10 = smov 113   ;;  %v552_v33 = vand.u32 127, %v12_v32 }
   0x3   :  { %21 = vrot.lane.b32.xlu0 %v17_v1, %s480_s13  ;;  %v19_v3 = vcombine.high %v17_v1, %v17_v1  ;;  %v87_v7 = vcombine.high %v429_v6, %v429_v6  ;;  %v138_v11 = vcombine.high %v433_v10, %v433_v10  ;;  %v435_v12 = vld [vmem:[%s817_s0 + $0x18] sm:$0xff]  ;;  %v439_v16 = vld [vmem:[%s817_s0 + $0x20] sm:$0xff]  ;;  %v443_v20 = vld [vmem:[%s817_s0 + $0x28] sm:$0xff]  ;;  %s486_s15 = smov 15   ;;  %s487_s20 = smov 17   ;;  %v118_v38 = vshrl.u32 %v12_v32, 7 }
   0x4   :  { %v158_v13 = vcombine.high %v435_v12, %v435_v12  ;;  %v437_v14 = vld [vmem:[%s817_s0 + $0x58] sm:$0xff]  ;;  %v212_v17 = vcombine.high %v439_v16, %v439_v16  ;;  %v441_v18 = vld [vmem:[%s817_s0 + $0x60] sm:$0xff]  ;;  %v267_v21 = vcombine.high %v443_v20, %v443_v20  ;;  %v445_v22 = vld [vmem:[%s817_s0 + $0x68] sm:$0xff]  ;;  %vm25_vm0 = vcmp.lt.s32.totalorder %v552_v33, 16 }
   0x5   :  { %v189_v15 = vcombine.high %v437_v14, %v437_v14  ;;  %v244_v19 = vcombine.high %v441_v18, %v441_v18  ;;  %v299_v23 = vcombine.high %v445_v22, %v445_v22  ;;  %v447_v24 = vld [vmem:[%s817_s0 + $0x30] sm:$0xff]  ;;  %v451_v28 = vld [vmem:[%s817_s0 + $0x38] sm:$0xff]  ;;  %v11_v36 = vld [vmem:[%s818_s1] sm:$0x3]  ;;  %v559_v37 = vadd.s32 128, %v552_v33 }
   0x6   :  { %46 = vrot.lane.b32.xlu1 %v42_v2, %s480_s13  ;;  %v320_v25 = vcombine.high %v447_v24, %v447_v24  ;;  %v449_v26 = vld [vmem:[%s817_s0 + $0x70] sm:$0xff]  ;;  %v373_v29 = vcombine.high %v451_v28, %v451_v28  ;;  %v453_v30 = vld [vmem:[%s817_s0 + $0x78] sm:$0xff]  ;;  %vm15_vm1 = vcmp.ge.s32.totalorder %v552_v33, 16  ;;  %vm103_vm2 = vcmp.ge.s32.totalorder %v11_v36, 1 }
   0x7   :  { %23 = vrot.lane.b32.xlu0 %v19_v3, %s480_s13  ;;  %v352_v27 = vcombine.high %v449_v26, %v449_v26  ;;  %v405_v31 = vcombine.high %v453_v30, %v453_v30  ;;  %vm59_vm3 = vcmp.lt.s32.totalorder %v559_v37, 240  ;;  %vm69_vm4 = vcmp.lt.s32.totalorder %v552_v33, 112 }
   0x8   :  { %v568_v49 = vsub.s32 0, %v118_v38  ;;  %v123_v50 = vsub.s32 1, %v118_v38  ;;  %v116_v54 = vsel %vm103_vm2, 1, %v488_v53  ;;  %vm154_vm5 = vcmp.lt.s32.totalorder %v11_v36, 15 }
   0x9   :  { %v167_v1 = vsel %vm154_vm5, 1, %v488_v53  ;;  %vm113_vm6 = vcmp.lt.s32.totalorder %v552_v33, 1  ;;  %vm164_vm12 = vcmp.lt.s32.totalorder %v552_v33, 127 }
   0xa   :  { %67 = vrot.lane.b32.xlu1 %v63_v5, %s481_s18  ;;  %v585_v59 = vrot.slane %v116_v54, %v568_v49  ;;  %v587_v60 = vrot.slane %v116_v54, %v123_v50 }
   0xb   :  { %65 = vrot.lane.b32.xlu0 %v427_v4, %s481_s18 }
   0xc   :  { %vm125_vm7 = vcmp.eq.s32.totalorder %v585_v59, 1  ;;  %vm126_vm8 = vcmp.eq.s32.totalorder %v587_v60, 1  ;;  %vm261_vm15 = vcmp.ne.s32.totalorder %v587_v60, 0 }
   0xd   :  { %vm263_vm2 = vmand %vm59_vm3, %vm261_vm15 }
   0xe   :  { %91 = vrot.lane.b32.xlu1 %v87_v7, %s481_s18 }
   0xf   :  { %89 = vrot.lane.b32.xlu0 %v429_v6, %s481_s18  ;;  %v602_v6 = vrot.slane %v167_v1, %v123_v50 }
  0x11   :  { %vm206_vm9 = vcmp.ne.s32.totalorder %v602_v6, 0  ;;  %vm177_vm14 = vcmp.eq.s32.totalorder %v602_v6, 1 }
  0x12   :  { %111 = vrot.lane.b32.xlu1 %v107_v9, %s482_s23  ;;  %vm208_vm11 = vmand %vm59_vm3, %vm206_vm9 }
  0x13   :  { %109 = vrot.lane.b32.xlu0 %v431_v8, %s482_s23 }
  0x16   :  { %142 = vrot.lane.b32.xlu1 %v138_v11, %s482_s23 }
  0x17   :  { %140 = vrot.lane.b32.xlu0 %v433_v10, %s482_s23 }
  0x1a   :  { %162 = vrot.lane.b32.xlu1 %v158_v13, %s483_s28 }
  0x1b   :  { %160 = vrot.lane.b32.xlu0 %v435_v12, %s483_s28  ;;  %v171_v12 = vrot.slane %v167_v1, %v568_v49 }
  0x1d   :  { %vm205_vm10 = vcmp.ne.s32.totalorder %v171_v12, 0  ;;  %vm176_vm13 = vcmp.eq.s32.totalorder %v171_v12, 1 }
  0x1e   :  { %193 = vrot.lane.b32.xlu1 %v189_v15, %s483_s28 }
  0x1f   :  { %191 = vrot.lane.b32.xlu0 %v437_v14, %s483_s28 }
  0x22   :  { %216 = vrot.lane.b32.xlu1 %v212_v17, %s484_s5 }
  0x23   :  { %214 = vrot.lane.b32.xlu0 %v439_v16, %s484_s5 }
  0x26   :  { %248 = vrot.lane.b32.xlu1 %v244_v19, %s484_s5 }
  0x27   :  { %246 = vrot.lane.b32.xlu0 %v441_v18, %s484_s5 }
  0x2a   :  { %271 = vrot.lane.b32.xlu1 %v267_v21, %s485_s10 }
  0x2b   :  { %269 = vrot.lane.b32.xlu0 %v443_v20, %s485_s10 }
  0x2e   :  { %303 = vrot.lane.b32.xlu1 %v299_v23, %s485_s10  ;;  %v222_v23 = vsel %vm208_vm11, 1, %v488_v53 }
  0x2f   :  { %301 = vrot.lane.b32.xlu0 %v445_v22, %s485_s10  ;;  %v221_v22 = vsel %vm205_vm10, 1, %v488_v53 }
  0x32   :  { %324 = vrot.lane.b32.xlu1 %v320_v25, %s486_s15 }
  0x33   :  { %322 = vrot.lane.b32.xlu0 %v447_v24, %s486_s15 }
  0x36   :  { %356 = vrot.lane.b32.xlu1 %v352_v27, %s486_s15 }
  0x37   :  { %354 = vrot.lane.b32.xlu0 %v449_v26, %s486_s15 }
  0x3a   :  { %377 = vrot.lane.b32.xlu1 %v373_v29, %s487_s20  ;;  %v226_v29 = vrot.slane %v221_v22, %v568_v49 }
  0x3b   :  { %375 = vrot.lane.b32.xlu0 %v451_v28, %s487_s20 }
  0x3c   :  { %vm666_vm5 = vcmp.eq.s32.totalorder %v226_v29, 1 }
  0x3e   :  { %409 = vrot.lane.b32.xlu1 %v405_v31, %s487_s20 }
  0x3f   :  { %407 = vrot.lane.b32.xlu0 %v453_v30, %s487_s20  ;;  %v230_v30 = vrot.slane %v222_v23, %v568_v49  ;;  %v383_v23 = vsel %vm261_vm15, 1, %v488_v53 }
  0x74   :  { %v45_v34 = vpop.permute.xlu1 %44 }
  0x75   :  { %v22_v35 = vpop.permute.xlu0 %21 }
  0x78   :  { %v47_v39 = vpop.permute.xlu1 %46 }
  0x79   :  { %v24_v40 = vpop.permute.xlu0 %23  ;;  %v48_v41 = vsel %vm25_vm0, %v45_v34, %v47_v39  ;;  %v49_v42 = vsel %vm25_vm0, %v47_v39, %v45_v34 }
  0x7a   :  { %v26_v43 = vsel %vm25_vm0, %v22_v35, %v24_v40  ;;  %v27_v44 = vsel %vm25_vm0, %v24_v40, %v22_v35  ;;  %v50_v45 = vsel %vm15_vm1, %v49_v42, 0.0  ;;  %vm260_vm0 = vcmp.ne.s32.totalorder %v585_v59, 0 }
  0x7b   :  { %v32_v46 = vsel %vm15_vm1, %v27_v44, 0.0  ;;  %v54_v47 = vcombine.low %v50_v45, %v48_v41  ;;  %v276_v37 = vsel %vm260_vm0, 1, %v488_v53  ;;  %v277_v44 = vsel %vm263_vm2, 1, %v488_v53 }
  0x7c   :  { %v36_v48 = vcombine.low %v32_v46, %v26_v43  ;;  %v68_v51 = vpop.permute.xlu1 %67 }
  0x7d   :  { %v66_v52 = vpop.permute.xlu0 %65  ;;  %426 = vst [vmem:[%s819_s2 + $0x40] sm:$0xff] %v54_v47 }
  0x7e   :  { %38 = vst [vmem:[%s819_s2] sm:$0xff] %v36_v48  ;;  %v70_v55 = vsel %vm69_vm4, %v66_v52, %v68_v51  ;;  %v71_v56 = vsel %vm69_vm4, %v68_v51, %v66_v52  ;;  %v281_v51 = vrot.slane %v276_v37, %v568_v49  ;;  %v285_v52 = vrot.slane %v277_v44, %v568_v49 }
  0x7f   :  { %v77_v57 = vsel %vm59_vm3, %v71_v56, 0.0 }
  0x80   :  { %v80_v58 = vcombine.low %v70_v55, %v77_v57  ;;  %v92_v61 = vpop.permute.xlu1 %91  ;;  %vm710_vm11 = vcmp.eq.s32.totalorder %v285_v52, 1 }
  0x81   :  { %v90_v62 = vpop.permute.xlu0 %89 }
  0x82   :  { %428 = vst [vmem:[%s819_s2 + $0x8] sm:$0xff] %v80_v58  ;;  %v93_v63 = vsel %vm69_vm4, %v90_v62, %v92_v61  ;;  %v94_v0 = vsel %vm69_vm4, %v92_v61, %v90_v62  ;;  %vm218_vm4 = vcmp.lt.s32.totalorder %v552_v33, 111 }
  0x83   :  { %v96_v2 = vsel %vm59_vm3, %v94_v0, 0.0  ;;  %vm315_vm3 = vmand %vm15_vm1, %vm205_vm10  ;;  %vm326_vm10 = vcmp.lt.s32.totalorder %v552_v33, 15 }
  0x84   :  { %v99_v3 = vcombine.low %v93_v63, %v96_v2  ;;  %v112_v4 = vpop.permute.xlu1 %111 }
  0x85   :  { %v110_v5 = vpop.permute.xlu0 %109 }
  0x86   :  { %430 = vst [vmem:[%s819_s2 + $0x48] sm:$0xff] %v99_v3  ;;  %v114_v7 = vsel %vm113_vm6, %v110_v5, %v112_v4  ;;  %v115_v8 = vsel %vm113_vm6, %v112_v4, %v110_v5  ;;  %v329_v3 = vsel %vm315_vm3, 1, %v488_v53  ;;  %v330_v4 = vsel %vm206_vm9, 1, %v488_v53  ;;  %vm368_vm9 = vmand %vm15_vm1, %vm260_vm0 }
  0x87   :  { %v127_v9 = vsel %vm125_vm7, %v115_v8, 0.0  ;;  %v128_v10 = vsel %vm126_vm8, %v114_v7, 0.0  ;;  %v334_v6 = vrot.slane %v329_v3, %v568_v49  ;;  %v382_v22 = vsel %vm368_vm9, 1, %v488_v53 }
  0x88   :  { %v131_v11 = vcombine.low %v127_v9, %v128_v10  ;;  %v143_v13 = vpop.permute.xlu1 %142  ;;  %v387_v60 = vrot.slane %v382_v22, %v568_v49  ;;  %v391_v53 = vrot.slane %v383_v23, %v568_v49  ;;  %vm379_vm1 = vcmp.lt.s32.totalorder %v552_v33, 17 }
  0x89   :  { %v141_v14 = vpop.permute.xlu0 %140 }
  0x8a   :  { %432 = vst [vmem:[%s819_s2 + $0x10] sm:$0xff] %v131_v11  ;;  %v144_v15 = vsel %vm113_vm6, %v141_v14, %v143_v13  ;;  %v145_v16 = vsel %vm113_vm6, %v143_v13, %v141_v14  ;;  %vm670_vm6 = vcmp.eq.s32.totalorder %v230_v30, 1  ;;  %v338_v11 = vrot.slane %v330_v4, %v568_v49 }
  0x8b   :  { %v146_v17 = vsel %vm125_vm7, %v145_v16, 0.0  ;;  %v147_v18 = vsel %vm126_vm8, %v144_v15, 0.0  ;;  %vm273_vm7 = vcmp.lt.s32.totalorder %v552_v33, 113  ;;  %vm706_vm8 = vcmp.eq.s32.totalorder %v281_v51, 1 }
  0x8c   :  { %v150_v19 = vcombine.low %v146_v17, %v147_v18  ;;  %v163_v20 = vpop.permute.xlu1 %162  ;;  %vm788_vm15 = vcmp.eq.s32.totalorder %v391_v53, 1 }
  0x8d   :  { %v161_v21 = vpop.permute.xlu0 %160 }
  0x8e   :  { %434 = vst [vmem:[%s819_s2 + $0x50] sm:$0xff] %v150_v19  ;;  %v165_v24 = vsel %vm164_vm12, %v161_v21, %v163_v20  ;;  %v166_v25 = vsel %vm164_vm12, %v163_v20, %v161_v21 }
  0x8f   :  { %v178_v26 = vsel %vm176_vm13, %v165_v24, 0.0  ;;  %v179_v27 = vsel %vm177_vm14, %v166_v25, 0.0 }
  0x90   :  { %v182_v28 = vcombine.low %v178_v26, %v179_v27  ;;  %v194_v31 = vpop.permute.xlu1 %193 }
  0x91   :  { %v192_v32 = vpop.permute.xlu0 %191 }
  0x92   :  { %436 = vst [vmem:[%s819_s2 + $0x18] sm:$0xff] %v182_v28  ;;  %v195_v34 = vsel %vm164_vm12, %v192_v32, %v194_v31  ;;  %v196_v35 = vsel %vm164_vm12, %v194_v31, %v192_v32  ;;  %vm747_vm12 = vcmp.eq.s32.totalorder %v334_v6, 1 }
  0x93   :  { %v197_v36 = vsel %vm176_vm13, %v195_v34, 0.0  ;;  %v198_v38 = vsel %vm177_vm14, %v196_v35, 0.0  ;;  %vm751_vm13 = vcmp.eq.s32.totalorder %v338_v11, 1  ;;  %vm784_vm14 = vcmp.eq.s32.totalorder %v387_v60, 1 }
  0x94   :  { %v201_v39 = vcombine.low %v197_v36, %v198_v38  ;;  %v217_v42 = vpop.permute.xlu1 %216 }
  0x95   :  { %v215_v43 = vpop.permute.xlu0 %214 }
  0x96   :  { %438 = vst [vmem:[%s819_s2 + $0x58] sm:$0xff] %v201_v39  ;;  %v219_v45 = vsel %vm218_vm4, %v215_v43, %v217_v42  ;;  %v220_v46 = vsel %vm218_vm4, %v217_v42, %v215_v43 }
  0x97   :  { %v233_v47 = vsel %vm666_vm5, %v219_v45, 0.0  ;;  %v234_v48 = vsel %vm670_vm6, %v220_v46, 0.0 }
  0x98   :  { %v237_v50 = vcombine.low %v233_v47, %v234_v48  ;;  %v249_v54 = vpop.permute.xlu1 %248 }
  0x99   :  { %v247_v55 = vpop.permute.xlu0 %246 }
  0x9a   :  { %440 = vst [vmem:[%s819_s2 + $0x20] sm:$0xff] %v237_v50  ;;  %v250_v56 = vsel %vm218_vm4, %v247_v55, %v249_v54  ;;  %v251_v57 = vsel %vm218_vm4, %v249_v54, %v247_v55 }
  0x9b   :  { %v252_v58 = vsel %vm666_vm5, %v250_v56, 0.0  ;;  %v253_v61 = vsel %vm670_vm6, %v251_v57, 0.0 }
  0x9c   :  { %v256_v62 = vcombine.low %v252_v58, %v253_v61  ;;  %v272_v1 = vpop.permute.xlu1 %271 }
  0x9d   :  { %v270_v2 = vpop.permute.xlu0 %269 }
  0x9e   :  { %442 = vst [vmem:[%s819_s2 + $0x60] sm:$0xff] %v256_v62  ;;  %v274_v5 = vsel %vm273_vm7, %v270_v2, %v272_v1  ;;  %v275_v7 = vsel %vm273_vm7, %v272_v1, %v270_v2 }
  0x9f   :  { %v288_v8 = vsel %vm706_vm8, %v274_v5, 0.0  ;;  %v289_v9 = vsel %vm710_vm11, %v275_v7, 0.0 }
  0xa0   :  { %v292_v10 = vcombine.low %v288_v8, %v289_v9  ;;  %v304_v12 = vpop.permute.xlu1 %303 }
  0xa1   :  { %v302_v13 = vpop.permute.xlu0 %301 }
  0xa2   :  { %444 = vst [vmem:[%s819_s2 + $0x28] sm:$0xff] %v292_v10  ;;  %v305_v14 = vsel %vm273_vm7, %v302_v13, %v304_v12  ;;  %v306_v15 = vsel %vm273_vm7, %v304_v12, %v302_v13 }
  0xa3   :  { %v307_v16 = vsel %vm706_vm8, %v305_v14, 0.0  ;;  %v308_v17 = vsel %vm710_vm11, %v306_v15, 0.0 }
  0xa4   :  { %v311_v18 = vcombine.low %v307_v16, %v308_v17  ;;  %v325_v59 = vpop.permute.xlu1 %324 }
  0xa5   :  { %v323_v21 = vpop.permute.xlu0 %322 }
  0xa6   :  { %446 = vst [vmem:[%s819_s2 + $0x68] sm:$0xff] %v311_v18  ;;  %v327_v24 = vsel %vm326_vm10, %v323_v21, %v325_v59  ;;  %v328_v25 = vsel %vm326_vm10, %v325_v59, %v323_v21 }
  0xa7   :  { %v341_v26 = vsel %vm747_vm12, %v328_v25, 0.0  ;;  %v342_v27 = vsel %vm751_vm13, %v327_v24, 0.0 }
  0xa8   :  { %v345_v28 = vcombine.low %v341_v26, %v342_v27  ;;  %v357_v29 = vpop.permute.xlu1 %356 }
  0xa9   :  { %v355_v30 = vpop.permute.xlu0 %354 }
  0xaa   :  { %448 = vst [vmem:[%s819_s2 + $0x30] sm:$0xff] %v345_v28  ;;  %v358_v31 = vsel %vm326_vm10, %v355_v30, %v357_v29  ;;  %v359_v32 = vsel %vm326_vm10, %v357_v29, %v355_v30 }
  0xab   :  { %v360_v34 = vsel %vm747_vm12, %v359_v32, 0.0  ;;  %v361_v35 = vsel %vm751_vm13, %v358_v31, 0.0 }
  0xac   :  { %v364_v49 = vcombine.low %v360_v34, %v361_v35  ;;  %v378_v39 = vpop.permute.xlu1 %377 }
  0xad   :  { %v376_v40 = vpop.permute.xlu0 %375 }
  0xae   :  { %450 = vst [vmem:[%s819_s2 + $0x70] sm:$0xff] %v364_v49  ;;  %v380_v41 = vsel %vm379_vm1, %v376_v40, %v378_v39  ;;  %v381_v42 = vsel %vm379_vm1, %v378_v39, %v376_v40 }
  0xaf   :  { %v394_v43 = vsel %vm784_vm14, %v381_v42, 0.0  ;;  %v395_v37 = vsel %vm788_vm15, %v380_v41, 0.0 }
  0xb0   :  { %v398_v44 = vcombine.low %v394_v43, %v395_v37  ;;  %v410_v45 = vpop.permute.xlu1 %409 }
  0xb1   :  { %v408_v46 = vpop.permute.xlu0 %407 }
  0xb2   :  { %452 = vst [vmem:[%s819_s2 + $0x38] sm:$0xff] %v398_v44  ;;  %v411_v47 = vsel %vm379_vm1, %v408_v46, %v410_v45  ;;  %v412_v48 = vsel %vm379_vm1, %v410_v45, %v408_v46 }
  0xb3   :  { %v413_v50 = vsel %vm784_vm14, %v412_v48, 0.0  ;;  %v414_v51 = vsel %vm788_vm15, %v411_v47, 0.0 }
  0xb4   :  { %v417_v52 = vcombine.low %v413_v50, %v414_v51 }
  0xb6   :  { %454 = vst [vmem:[%s819_s2 + $0x78] sm:$0xff] %v417_v52 }

</bundles_post_ra>
